<compile_context>
chip_gen: v7x
topology: tpu7x:2x2x1
jax: 0.10.0
libtpu: 0.0.40
codegen_flags: <defaults>
</compile_context>

<pallas_src>
import jax
import jax.numpy as jnp
from jax.experimental import pallas as pl
from jax.experimental.pallas import tpu as pltpu


def adapter_fc_kernel(x_ref, w1_ref, b1_ref, w2_ref, b2_ref, w3_ref, b3_ref, o_ref):
    """Fused MLP adapter on natural-layout tiles.

    x_ref  : (TB, C)   batch-on-sublanes input tile (dtype = caller's x dtype)
    wk_ref : (in, out) weights (resident in VMEM; may be bf16)
    bk_ref : (1, out)  f32 biases, broadcast along sublanes
    o_ref  : (TB, C)   output tile = relu(relu(x W1 + b1) W2 + b2) W3 + b3 + x
    """
    x = x_ref[...]
    # fc1 + ReLU -> (TB, m). Cast to weight dtype only for the MXU feed (VPU cast is
    # free filler); accumulation, bias, ReLU and residual stay f32.
    h = jnp.dot(x.astype(w1_ref.dtype), w1_ref[...], preferred_element_type=jnp.float32)
    h = jnp.maximum(h + b1_ref[...], 0.0)
    # fc2 + ReLU -> (TB, m)
    h = jnp.dot(h.astype(w2_ref.dtype), w2_ref[...], preferred_element_type=jnp.float32)
    h = jnp.maximum(h + b2_ref[...], 0.0)
    # fc3 + bias + residual -> (TB, C)
    y = jnp.dot(h.astype(w3_ref.dtype), w3_ref[...], preferred_element_type=jnp.float32)
    o_ref[...] = (y + b3_ref[...] + x.astype(jnp.float32)).astype(o_ref.dtype)


def _round_up(a, m):
    return (a + m - 1) // m * m


def adapter_fc(x, w1, b1, w2, b2, w3, b3, *, tb_max=8192, min_steps=2, weight_dtype=None):
    """x: (..., in_channels). Weights are (in, out) (PyTorch weight.T); biases (1, out).

    weight_dtype: optionally cast the (tiny) weights, e.g. jnp.bfloat16. x itself is
    never cast in the wrapper; the kernel casts it just before the dots, so the
    residual add and the output keep x's precision/dtype.
    """
    orig_shape = x.shape
    out_dtype = x.dtype
    C = orig_shape[-1]
    x2 = x.reshape(-1, C)  # trailing-dim reshape only; no transpose, no HBM pass
    B = x2.shape[0]

    if weight_dtype is not None:
        w1 = w1.astype(weight_dtype)
        w2 = w2.astype(weight_dtype)
        w3 = w3.astype(weight_dtype)

    b1c = b1.reshape(1, -1).astype(jnp.float32)
    b2c = b2.reshape(1, -1).astype(jnp.float32)
    b3c = b3.reshape(1, -1).astype(jnp.float32)
    m = w1.shape[1]

    # Batch tile on sublanes: as large as possible (amortizes ~600-cycle per-step
    # overhead) but keeping >= min_steps grid steps so both v7x TensorCores get work.
    # Block shape (TB, C): C equals the full last dim, TB is a multiple of 8, so the
    # (8,128) rule is satisfied; the 53-lane store is masked but HBM-side contiguous.
    # VMEM: double-buffered in+out tiles at TB=8192 f32 are ~7 MB -> no limit override.
    TB = max(8, min(tb_max, _round_up(-(-B // min_steps), 8)))
    grid = (pl.cdiv(B, TB),)  # ragged last block: OOB reads padded, writes masked

    const = lambda i: (0, 0)  # weights/biases: same block every step -> stay resident
    out = pl.pallas_call(
        adapter_fc_kernel,
        out_shape=jax.ShapeDtypeStruct((B, C), out_dtype),
        grid=grid,
        in_specs=[
            pl.BlockSpec((TB, C), lambda i: (i, 0)),  # x tile streams over batch rows
            pl.BlockSpec((C, m), const),              # W1
            pl.BlockSpec((1, m), const),              # b1
            pl.BlockSpec((m, m), const),              # W2
            pl.BlockSpec((1, m), const),              # b2
            pl.BlockSpec((m, C), const),              # W3
            pl.BlockSpec((1, C), const),              # b3
        ],
        out_specs=pl.BlockSpec((TB, C), lambda i: (i, 0)),
        compiler_params=pltpu.CompilerParams(
            dimension_semantics=("parallel",),        # megacore-shard batch axis (v7x)
        ),
    )(x2, w1, b1c, w2, b2c, w3, b3c)

    return out.reshape(orig_shape)


def init_params(key, in_channels, m_channels=16, dtype=jnp.float32):
    """Deterministic synthetic init mimicking nn.Linear (uniform in +/- 1/sqrt(fan_in)).
    Weights returned as (in, out); biases as (1, out)."""
    ks = jax.random.split(key, 6)

    def lin(kw, kb, fan_in, fan_out):
        bound = 1.0 / jnp.sqrt(fan_in)
        w = jax.random.uniform(kw, (fan_in, fan_out), dtype, -bound, bound)
        b = jax.random.uniform(kb, (1, fan_out), dtype, -bound, bound)
        return w, b

    w1, b1 = lin(ks[0], ks[1], in_channels, m_channels)
    w2, b2 = lin(ks[2], ks[3], m_channels, m_channels)
    w3, b3 = lin(ks[4], ks[5], m_channels, in_channels)
    return w1, b1, w2, b2, w3, b3


def adapter_fc_ref(x, w1, b1, w2, b2, w3, b3):
    """Pure-JAX reference of the PyTorch Adapter_FC forward."""
    h = jnp.maximum(x @ w1 + b1, 0.0)
    h = jnp.maximum(h @ w2 + b2, 0.0)
    y = h @ w3 + b3
    return y + x


if __name__ == "__main__":
    key = jax.random.PRNGKey(0)
    k_x, k_p, k_v = jax.random.split(key, 3)

    in_channels, m_channels = 53, 16
    params = init_params(k_p, in_channels, m_channels)

    # Frame-batch path (T, 53), matching PerceptualEncoder's non-video branch.
    x = jax.random.normal(k_x, (8, in_channels), jnp.float32)
    ref = adapter_fc_ref(x, *params)
    out = jax.block_until_ready(adapter_fc(x, *params))
    assert out.shape == x.shape
    assert jnp.allclose(out, ref, atol=1e-5, rtol=1e-5)

    # Video-batch path (B, T, 53) with a ragged last grid block (exercises the
    # no-jnp.pad path: OOB reads padded, OOB writes masked).
    xv = jax.random.normal(k_v, (2, 150, in_channels), jnp.float32)
    refv = adapter_fc_ref(xv, *params)
    outv = jax.block_until_ready(adapter_fc(xv, *params))
    assert outv.shape == xv.shape
    assert jnp.allclose(outv, refv, atol=1e-5, rtol=1e-5)

    # bf16-weights path: only the tiny weights are cast; x, residual and output stay f32.
    out_bf16 = jax.block_until_ready(adapter_fc(xv, *params, weight_dtype=jnp.bfloat16))
    assert out_bf16.shape == xv.shape
    assert out_bf16.dtype == xv.dtype
    assert jnp.allclose(out_bf16, refv, atol=1e-1, rtol=1e-1)

    print("KERNEL_OK")
</pallas_src>

<mosaic_0001>
module attributes {stable_mosaic.version = 11 : i64} {
  func.func @adapter_fc_kernel(%arg0: i32, %arg1: memref<8x53xf32, #tpu.memory_space<vmem>>, %arg2: memref<53x16xf32, #tpu.memory_space<vmem>>, %arg3: memref<1x16xf32, #tpu.memory_space<vmem>>, %arg4: memref<16x16xf32, #tpu.memory_space<vmem>>, %arg5: memref<1x16xf32, #tpu.memory_space<vmem>>, %arg6: memref<16x53xf32, #tpu.memory_space<vmem>>, %arg7: memref<1x53xf32, #tpu.memory_space<vmem>>, %arg8: memref<8x53xf32, #tpu.memory_space<vmem>>) attributes {dimension_semantics = [#tpu.dimension_semantics<parallel>], iteration_bounds = array<i64: 1>, scalar_prefetch = 0 : i64, scratch_operands = 0 : i64, tpu.core_type = #tpu.core_type<tc>, window_params = [{transform_indices = @transform_0, window_bounds = array<i64: 8, 53>}, {pipeline_mode = #tpu.pipeline_mode<synchronous>, transform_indices = @transform_1, window_bounds = array<i64: 53, 16>}, {pipeline_mode = #tpu.pipeline_mode<synchronous>, transform_indices = @transform_2, window_bounds = array<i64: 1, 16>}, {pipeline_mode = #tpu.pipeline_mode<synchronous>, transform_indices = @transform_3, window_bounds = array<i64: 16, 16>}, {pipeline_mode = #tpu.pipeline_mode<synchronous>, transform_indices = @transform_4, window_bounds = array<i64: 1, 16>}, {pipeline_mode = #tpu.pipeline_mode<synchronous>, transform_indices = @transform_5, window_bounds = array<i64: 16, 53>}, {pipeline_mode = #tpu.pipeline_mode<synchronous>, transform_indices = @transform_6, window_bounds = array<i64: 1, 53>}, {transform_indices = @transform_7, window_bounds = array<i64: 8, 53>}]} {
    %c0 = arith.constant 0 : index
    %c0_0 = arith.constant 0 : index
    %0 = vector.load %arg1[%c0, %c0_0] : memref<8x53xf32, #tpu.memory_space<vmem>>, vector<8x53xf32>
    %c0_1 = arith.constant 0 : index
    %c0_2 = arith.constant 0 : index
    %1 = vector.load %arg2[%c0_1, %c0_2] : memref<53x16xf32, #tpu.memory_space<vmem>>, vector<53x16xf32>
    %cst = arith.constant dense<0.000000e+00> : vector<8x16xf32>
    %2 = tpu.matmul %0, %1, %cst {dimension_numbers = #tpu.dot_dimension_numbers<[1], [0], [0], [1], [0, 0, 1, 1], [], []>} : vector<8x53xf32>, vector<53x16xf32>, vector<8x16xf32> -> vector<8x16xf32>
    %c0_3 = arith.constant 0 : index
    %c0_4 = arith.constant 0 : index
    %3 = vector.load %arg3[%c0_3, %c0_4] : memref<1x16xf32, #tpu.memory_space<vmem>>, vector<1x16xf32>
    %4 = vector.broadcast %3 : vector<1x16xf32> to vector<8x16xf32>
    %5 = arith.addf %2, %4 : vector<8x16xf32>
    %cst_5 = arith.constant 0.000000e+00 : f32
    %6 = vector.broadcast %cst_5 : f32 to vector<8x16xf32>
    %7 = arith.maximumf %5, %6 : vector<8x16xf32>
    %c0_6 = arith.constant 0 : index
    %c0_7 = arith.constant 0 : index
    %8 = vector.load %arg4[%c0_6, %c0_7] : memref<16x16xf32, #tpu.memory_space<vmem>>, vector<16x16xf32>
    %cst_8 = arith.constant dense<0.000000e+00> : vector<8x16xf32>
    %9 = tpu.matmul %7, %8, %cst_8 {dimension_numbers = #tpu.dot_dimension_numbers<[1], [0], [0], [1], [0, 0, 1, 1], [], []>} : vector<8x16xf32>, vector<16x16xf32>, vector<8x16xf32> -> vector<8x16xf32>
    %c0_9 = arith.constant 0 : index
    %c0_10 = arith.constant 0 : index
    %10 = vector.load %arg5[%c0_9, %c0_10] : memref<1x16xf32, #tpu.memory_space<vmem>>, vector<1x16xf32>
    %11 = vector.broadcast %10 : vector<1x16xf32> to vector<8x16xf32>
    %12 = arith.addf %9, %11 : vector<8x16xf32>
    %cst_11 = arith.constant 0.000000e+00 : f32
    %13 = vector.broadcast %cst_11 : f32 to vector<8x16xf32>
    %14 = arith.maximumf %12, %13 : vector<8x16xf32>
    %c0_12 = arith.constant 0 : index
    %c0_13 = arith.constant 0 : index
    %15 = vector.load %arg6[%c0_12, %c0_13] : memref<16x53xf32, #tpu.memory_space<vmem>>, vector<16x53xf32>
    %cst_14 = arith.constant dense<0.000000e+00> : vector<8x53xf32>
    %16 = tpu.matmul %14, %15, %cst_14 {dimension_numbers = #tpu.dot_dimension_numbers<[1], [0], [0], [1], [0, 0, 1, 1], [], []>} : vector<8x16xf32>, vector<16x53xf32>, vector<8x53xf32> -> vector<8x53xf32>
    %c0_15 = arith.constant 0 : index
    %c0_16 = arith.constant 0 : index
    %17 = vector.load %arg7[%c0_15, %c0_16] : memref<1x53xf32, #tpu.memory_space<vmem>>, vector<1x53xf32>
    %18 = vector.broadcast %17 : vector<1x53xf32> to vector<8x53xf32>
    %19 = arith.addf %16, %18 : vector<8x53xf32>
    %20 = arith.addf %19, %0 : vector<8x53xf32>
    %c0_17 = arith.constant 0 : index
    %c0_18 = arith.constant 0 : index
    %21 = vector.load %arg8[%c0_17, %c0_18] : memref<8x53xf32, #tpu.memory_space<vmem>>, vector<8x53xf32>
    tpu.vector_store %arg8[%c0_17, %c0_18], %20 {strides = array<i32>} : memref<8x53xf32, #tpu.memory_space<vmem>>, vector<8x53xf32>,
    return
  }
  func.func @transform_0(%arg0: i32) -> (i32, i32) {
    %c0_i32 = arith.constant 0 : i32
    %c0_i32_0 = arith.constant 0 : i32
    return %arg0, %c0_i32 : i32, i32
  }
  func.func @transform_1(%arg0: i32) -> (i32, i32) {
    %c0_i32 = arith.constant 0 : i32
    %c0_i32_0 = arith.constant 0 : i32
    %c0_i32_1 = arith.constant 0 : i32
    return %c0_i32, %c0_i32_0 : i32, i32
  }
  func.func @transform_2(%arg0: i32) -> (i32, i32) {
    %c0_i32 = arith.constant 0 : i32
    %c0_i32_0 = arith.constant 0 : i32
    %c0_i32_1 = arith.constant 0 : i32
    return %c0_i32, %c0_i32_0 : i32, i32
  }
  func.func @transform_3(%arg0: i32) -> (i32, i32) {
    %c0_i32 = arith.constant 0 : i32
    %c0_i32_0 = arith.constant 0 : i32
    %c0_i32_1 = arith.constant 0 : i32
    return %c0_i32, %c0_i32_0 : i32, i32
  }
  func.func @transform_4(%arg0: i32) -> (i32, i32) {
    %c0_i32 = arith.constant 0 : i32
    %c0_i32_0 = arith.constant 0 : i32
    %c0_i32_1 = arith.constant 0 : i32
    return %c0_i32, %c0_i32_0 : i32, i32
  }
  func.func @transform_5(%arg0: i32) -> (i32, i32) {
    %c0_i32 = arith.constant 0 : i32
    %c0_i32_0 = arith.constant 0 : i32
    %c0_i32_1 = arith.constant 0 : i32
    return %c0_i32, %c0_i32_0 : i32, i32
  }
  func.func @transform_6(%arg0: i32) -> (i32, i32) {
    %c0_i32 = arith.constant 0 : i32
    %c0_i32_0 = arith.constant 0 : i32
    %c0_i32_1 = arith.constant 0 : i32
    return %c0_i32, %c0_i32_0 : i32, i32
  }
  func.func @transform_7(%arg0: i32) -> (i32, i32) {
    %c0_i32 = arith.constant 0 : i32
    %c0_i32_0 = arith.constant 0 : i32
    return %arg0, %c0_i32 : i32, i32
  }
}

</mosaic_0001>

<bundles_post_ra>
// kernel: tpu_custom_call.1
= control target key start
LH: loop header
LB: loop body
LE: loop exit
PB: predicated region body
PF: predicated region fallthrough
CT: control target
= control target key end

     0   :  { %v398_v3 = vmov 0.0|0.0   ;;  %vm399_vm0 = vmmov 0   ;;  %v400_v6 = vmov 0.0   ;;  %s504_s0 = inlined_call_operand.vmem [shape: f32[8,53], index: 0, kind: input, shape index: {}]   ;;  %s505_s1 = inlined_call_operand.vmem [shape: f32[53,16], index: 1, kind: input, shape index: {}]   ;;  %s506_s2 = inlined_call_operand.vmem [shape: f32[1,16], index: 2, kind: input, shape index: {}]   ;;  %s507_s3 = inlined_call_operand.vmem [shape: f32[16,16], index: 3, kind: input, shape index: {}]   ;;  %s508_s4 = inlined_call_operand.vmem [shape: f32[1,16], index: 4, kind: input, shape index: {}]   ;;  %s509_s5 = inlined_call_operand.vmem [shape: f32[16,53], index: 5, kind: input, shape index: {}]   ;;  %s510_s6 = inlined_call_operand.vmem [shape: f32[1,53], index: 6, kind: input, shape index: {}]   ;;  %s511_s7 = inlined_call_operand.hbm [shape: f32[8,53], index: 7, kind: output, shape index: {}]  }
   0x1   :  { %v28_v0 = vld [vmem:[%s505_s1] sm:$0xff]  ;;  %v29_v1 = vld [vmem:[%s505_s1 + $0x8] sm:$0xff]  ;;  %v30_v2 = vld [vmem:[%s505_s1 + $0x10] sm:$0xff]  ;;  %355 = vmatprep.subr.bf16.mxu0 %v398_v3  ;;  %364 = vmatprep.subr.bf16.mxu1 %v398_v3 }
   0x2   :  { %v356_v4 = vpack.c.bf16 %v29_v1, %v28_v0  ;;  %v31_v5 = vld [vmem:[%s505_s1 + $0x18] sm:$0xff]  ;;  %338 = vmatprep.mubr.msk.f32.mxu0 %vm399_vm0, %v400_v6  ;;  %345 = vmatprep.mubr.msk.f32.mxu1 %vm399_vm0, %v400_v6 }
   0x3   :  { %v359_v7 = vpack.c.bf16 %v31_v5, %v30_v2 }
   0x4   :  { %357 = vmatpush3.bf16.msra.mxu0 %v356_v4 }
   0x5   :  { %12 = vsyncpa [#allocation3], 0  ;;  %358 = vmatprep.subr.bf16.mxu0 %v398_v3  ;;  %v32_v8 = vld [vmem:[%s505_s1 + $0x20] sm:$0xff]  ;;  %v33_v9 = vld [vmem:[%s505_s1 + $0x28] sm:$0xff]  ;;  %vm46_vm1 = vcmask 1044480   ;;  %vm42_vm2 = vcmask 433152  }
   0x6   :  { %v362_v10 = vpack.c.bf16 %v33_v9, %v32_v8  ;;  %v34_v11 = vld [vmem:[%s505_s1 + $0x30] sm:$0x1f]  ;;  %v27_v12 = vld [vmem:[%s504_s0] sm:$0xff]  ;;  %v122_v14 = vld [vmem:[%s507_s3 + $0x8] sm:$0xff]  ;;  %vm130_vm3 = vcmask 130048   ;;  %s401_s27 = smov [#allocation2]  }
   0x7   :  { %v121_v13 = vld [vmem:[%s507_s3] sm:$0xff]  ;;  %v206_v22 = vld [vmem:[%s509_s5 + $0x8] sm:$0xff]  ;;  %s295_s28 = sshll.u32 %s401_s27, 4  ;;  %s296_s28 = int_to_ptr.vmem [resolvable:$true] %s295_s28 }
   0x8   :  { %360 = vmatpush3.bf16.msra.mxu0 %v359_v7  ;;  %v365_v15 = vpack.c.bf16 %v122_v14, %v121_v13  ;;  %v303_v16 = vld [vmem:[%s506_s2] ss:$0 sm:$0xff]  ;;  %p379_p1 = scmp.lt.s32.totalorder %s296_s28, %s296_s28 }
   0x9   :  { %361 = vmatprep.subr.bf16.mxu0 %v398_v3  ;;  %v205_v21 = vld [vmem:[%s509_s5] sm:$0xff]  ;;  %s374_s5 = scalar_lea.vmem %s296_s28, 128 }
   0xa   :  { %366 = vmatpush3.bf16.msra.mxu1 %v365_v15  ;;  %v368_v23 = vpack.c.bf16 %v206_v22, %v205_v21  ;;  %v306_v24 = vld [vmem:[%s508_s4] ss:$0 sm:$0xff]  ;;  %p375_p0 = scmp.ne.s32.totalorder %s296_s28, %s374_s5  ;;  %p380_p2 = scmp.lt.s32.totalorder %s374_s5, %s374_s5 }
   0xb   :  { %367 = vmatprep.subr.bf16.mxu1 %v398_v3  ;;  %v308_v29 = vld [vmem:[%s510_s6] ss:$0 sm:$0xff] }
   0xc   :  { %363 = vmatpush3.bf16.msra.mxu0 %v362_v10  ;;  %p381_p3 = por %p380_p2, %p379_p1 }
   0xd   :  { %336 = vmatprep.subr.mxu0 %v400_v6 }
   0xe   :  { %p382_p4 = pnand %p381_p3, %p375_p0 }
  0x10   :  { %337 = vmatpush3.msk.msra.mxu0 %vm46_vm1, %v34_v11 }
  0x11   :  { %339 = vmatmul.mubr.msk.f32.vlgmr.msra.gmra.mrb[0].mxu0 %vm42_vm2, %v27_v12 }
  0xe4   :  { %v116_v17 = vpop.f32.mrb[0].mxu0 }
  0xe5   :  { %v117_v18 = vadd.f32 %v303_v16, %v116_v17  ;;  %v340_v19 = vpop.f32.mrb[1].mxu0 }
  0xe7   :  { %v120_v20 = vmax.f32 %v117_v18, 0.0 }
  0xe9   :  { %346 = vmatmul.mubr.msk.f32.vlgmr.msra.gmra.mrb[0].mxu1 %vm130_vm3, %v120_v20 }
  0xea   :  { %352 = vmatprep.mubr.msk.f32.mxu1 %vm399_vm0, %v400_v6  ;;  %369 = vmatpush3.bf16.msra.mxu1 %v368_v23 }
 0x1bc   :  { %v200_v25 = vpop.f32.mrb[0].mxu1 }
 0x1bd   :  { %v201_v26 = vadd.f32 %v306_v24, %v200_v25  ;;  %v347_v27 = vpop.f32.mrb[1].mxu1 }
 0x1bf   :  { %v204_v28 = vmax.f32 %v201_v26, 0.0 }
 0x1c1   :  { %353 = vmatmul.mubr.msk.f32.vlgmr.msra.gmra.mrb[2].mxu1 %vm130_vm3, %v204_v28 }
 0x294   :  { %v283_v30 = vpop.f32.mrb[2].mxu1 }
 0x295   :  { %v284_v31 = vadd.f32 %v308_v29, %v283_v30  ;;  %v354_v32 = vpop.f32.mrb[3].mxu1 }
 0x297   :  { %v287_v33 = vadd.f32 %v284_v31, %v27_v12 }
 0x299   :  { %288 = vst.msk [vmem:[#allocation2] sm:$0xff] %vm42_vm2, %v287_v33 }
 0x29a   :  { %385 = shalt.err (!%p382_p4)
}
 0x29b   :  { %s386_s6 = scalar_lea.hbm %s511_s7, 128 }
 0x29c   :  { %p387_p5 = scmp.ne.s32.totalorder %s511_s7, %s386_s6  ;;  %p390_p6 = scmp.lt.u32.totalorder %s386_s6, %s511_s7 }
 0x29e   :  { %p392_p7 = pnand %p390_p6, %p387_p5 }
 0x2a0   :  { %395 = shalt.err (!%p392_p7)
}
 0x2a1   :  { %298 = dma.vmem_to_hbm [thread:$0]  %s296_s28, 128, %s511_s7, [#allocation3]  }
 0x2a2   :  { %396 = dma.done.wait [#allocation3], 128  }
 0x2a3   :  { %397 = vsyncadd [#allocation3], 4294967168 }
 0x2a4   :  { %302 = vsyncpa [#allocation3], 1 }

</bundles_post_ra>
